<compile_context>
chip_gen: v5e
topology: v5e:2x2
jax: 0.10.0
libtpu: 0.0.40
codegen_flags: <defaults>
</compile_context>

<pallas_src>
import functools

import jax
import jax.numpy as jnp
import numpy as np
from jax.experimental import pallas as pl
from jax.experimental.pallas import tpu as pltpu

# ---------------- model config (small, DBRX-like) ----------------
D = 64            # d_model
H = 4             # n_heads
HD = D // H       # head_size = 16
KVH = 2           # attn_config.kv_n_heads
GROUPS = H // KVH
T = 8             # num tokens (single prefill sequence)
CACHE_SLOTS = 16  # flattened kv-cache slots
CLIP_QKV = 0.5    # attn_config.clip_qkv
ROPE_THETA = 10000.0
SCALE = HD ** -0.5
QKV_DIM = H * HD + 2 * KVH * HD   # 128
KV_DIM = KVH * HD                 # 32


# ---------------- kernel 1: fused Wqkv + clip + RoPE + causal GQA attn + out_proj ----
def fused_attn_kernel(x_ref, wqkv_ref, wo_ref, cos_ref, sin_ref,
                      out_ref, knew_ref, vnew_ref, attn_scr,
                      *, scale, clip, num_heads, num_kv_heads, head_dim):
    t = x_ref.shape[0]
    half = head_dim // 2
    groups = num_heads // num_kv_heads
    k_off = num_heads * head_dim
    v_off = k_off + num_kv_heads * head_dim

    # (1) Wqkv projection + clip_qkv (single MXU matmul, f32 accumulation).
    qkv = jnp.dot(x_ref[...], wqkv_ref[...], preferred_element_type=jnp.float32)
    qkv = jnp.clip(qkv, -clip, clip)

    # Hoisted loop-invariants.
    cos = cos_ref[...]                                        # [t, half]
    sin = sin_ref[...]
    row = jax.lax.broadcasted_iota(jnp.int32, (t, t), 0)
    col = jax.lax.broadcasted_iota(jnp.int32, (t, t), 1)
    causal = col <= row

    for g in range(num_kv_heads):
        # --- RoPE on K head g (NeoX rotate-half); halves written directly,
        #     no concatenate, no per-head grid step.
        k1 = qkv[:, k_off + g * head_dim: k_off + g * head_dim + half]
        k2 = qkv[:, k_off + g * head_dim + half: k_off + (g + 1) * head_dim]
        k1r = k1 * cos - k2 * sin
        k2r = k2 * cos + k1 * sin
        knew_ref[:, g * head_dim: g * head_dim + half] = k1r.astype(knew_ref.dtype)
        knew_ref[:, g * head_dim + half: (g + 1) * head_dim] = k2r.astype(knew_ref.dtype)

        vg = qkv[:, v_off + g * head_dim: v_off + (g + 1) * head_dim]
        vnew_ref[:, g * head_dim: (g + 1) * head_dim] = vg.astype(vnew_ref.dtype)

        # --- all `groups` query heads of this KV group share K/V (GQA), no
        #     duplicate K/V loads -- everything lives in registers here.
        for hh in range(groups):
            h = g * groups + hh
            q1 = qkv[:, h * head_dim: h * head_dim + half]
            q2 = qkv[:, h * head_dim + half: (h + 1) * head_dim]
            q1r = q1 * cos - q2 * sin
            q2r = q2 * cos + q1 * sin
            # q_rot @ k_rot^T computed directly on the two halves, so the
            # rotated vectors never need to be re-assembled.
            s = (jax.lax.dot_general(q1r, k1r, (((1,), (1,)), ((), ())),
                                     preferred_element_type=jnp.float32)
                 + jax.lax.dot_general(q2r, k2r, (((1,), (1,)), ((), ())),
                                       preferred_element_type=jnp.float32)) * scale
            s = jnp.where(causal, s, -jnp.inf)
            m = jnp.max(s, axis=-1, keepdims=True)
            p = jnp.exp(s - m)
            l = jnp.sum(p, axis=-1, keepdims=True)
            o = jnp.dot(p, vg, preferred_element_type=jnp.float32)
            o = o * pl.reciprocal(l, approx=False)   # EUP; keep exact for 1e-4 tol
            # lane-dense [t, H*HD] attention slab assembled in VMEM scratch
            attn_scr[:, h * head_dim: (h + 1) * head_dim] = o

    # (2) out_proj on the lane-dense slab (single MXU matmul).
    out_ref[...] = jnp.dot(attn_scr[...], wo_ref[...],
                           preferred_element_type=jnp.float32).astype(out_ref.dtype)


def fused_attention_forward(hidden, wqkv_t, wo_t, cos, sin):
    t, d = hidden.shape
    qkv_dim = wqkv_t.shape[1]
    kernel = functools.partial(
        fused_attn_kernel, scale=SCALE, clip=CLIP_QKV,
        num_heads=H, num_kv_heads=KVH, head_dim=HD)
    return pl.pallas_call(
        kernel,
        out_shape=(
            jax.ShapeDtypeStruct((t, d), hidden.dtype),       # attn out_proj
            jax.ShapeDtypeStruct((t, KV_DIM), hidden.dtype),  # rotated K (lane-dense)
            jax.ShapeDtypeStruct((t, KV_DIM), hidden.dtype),  # V (lane-dense)
        ),
        grid=(1,),
        in_specs=[
            pl.BlockSpec((t, d), lambda i: (0, 0)),
            pl.BlockSpec((d, qkv_dim), lambda i: (0, 0)),
            pl.BlockSpec((d, d), lambda i: (0, 0)),
            pl.BlockSpec((t, HD // 2), lambda i: (0, 0)),
            pl.BlockSpec((t, HD // 2), lambda i: (0, 0)),
        ],
        out_specs=(
            pl.BlockSpec((t, d), lambda i: (0, 0)),
            pl.BlockSpec((t, KV_DIM), lambda i: (0, 0)),
            pl.BlockSpec((t, KV_DIM), lambda i: (0, 0)),
        ),
        scratch_shapes=[pltpu.VMEM((t, H * HD), jnp.float32)],
        # single-block grid; at real sizes the token/head tile axes would be
        # marked "parallel" to use both v7x TensorCores.
        compiler_params=pltpu.CompilerParams(dimension_semantics=("parallel",)),
    )(hidden, wqkv_t, wo_t, cos, sin)


# ---------------- kernel 2: reshape_and_cache (aliased O(T) scatter) ----------------
def cache_write_kernel(slots_ref, knew_ref, vnew_ref, kc_hbm_ref, vc_hbm_ref,
                       kc_out_ref, vc_out_ref):
    # `slots_ref` is consumed by the output index_map; the HBM cache inputs only
    # exist to alias the output buffers (untouched rows are preserved by the
    # aliasing, no full-cache read/rewrite).
    del slots_ref, kc_hbm_ref, vc_hbm_ref
    kc_out_ref[...] = knew_ref[...]
    vc_out_ref[...] = vnew_ref[...]


def pallas_reshape_and_cache(slots, k_tok, v_tok, k_cache, v_cache):
    t, kvh, hd = k_tok.shape
    tok_map = lambda i, slots: (i, 0, 0)
    slot_map = lambda i, slots: (slots[i], 0, 0)   # data-dependent scatter

    grid_spec = pltpu.PrefetchScalarGridSpec(
        num_scalar_prefetch=1,
        grid=(t,),
        in_specs=[
            pl.BlockSpec((1, kvh, hd), tok_map),
            pl.BlockSpec((1, kvh, hd), tok_map),
            pl.BlockSpec(memory_space=pl.ANY),     # k_cache (aliased, never read)
            pl.BlockSpec(memory_space=pl.ANY),     # v_cache (aliased, never read)
        ],
        out_specs=[
            pl.BlockSpec((1, kvh, hd), slot_map),
            pl.BlockSpec((1, kvh, hd), slot_map),
        ],
    )
    return pl.pallas_call(
        cache_write_kernel,
        grid_spec=grid_spec,
        out_shape=(
            jax.ShapeDtypeStruct(k_cache.shape, k_cache.dtype),
            jax.ShapeDtypeStruct(v_cache.shape, v_cache.dtype),
        ),
        # inputs are (slots, k_tok, v_tok, k_cache, v_cache) -> alias caches to outs
        input_output_aliases={3: 0, 4: 1},
        compiler_params=pltpu.CompilerParams(dimension_semantics=("arbitrary",)),
    )(slots, k_tok, v_tok, k_cache, v_cache)


# ---------------- DbrxAttention.forward (prefill) ----------------
def dbrx_attention_forward(hidden, cos, sin, slots, k_cache, v_cache, wqkv_t, wo_t):
    out, k_new, v_new = fused_attention_forward(hidden, wqkv_t, wo_t, cos, sin)
    # trailing-dim split; metadata-only reshape in row-major XLA (no transpose).
    k_new3 = k_new.reshape(T, KVH, HD)
    v_new3 = v_new.reshape(T, KVH, HD)
    new_kc, new_vc = pallas_reshape_and_cache(slots, k_new3, v_new3, k_cache, v_cache)
    return out, new_kc, new_vc


# ---------------- pure-JAX reference ----------------
def reference_forward(hidden, cos, sin, slots, k_cache, v_cache, wqkv_t, wo_t):
    qkv = jnp.clip(hidden @ wqkv_t, -CLIP_QKV, CLIP_QKV)
    q = qkv[:, : H * HD].reshape(T, H, HD)
    k = qkv[:, H * HD: H * HD + KVH * HD].reshape(T, KVH, HD)
    v = qkv[:, H * HD + KVH * HD:].reshape(T, KVH, HD)

    def rope(x):
        x1, x2 = x[..., : HD // 2], x[..., HD // 2:]
        c, s = cos[:, None, :], sin[:, None, :]
        return jnp.concatenate([x1 * c - x2 * s, x2 * c + x1 * s], axis=-1)

    q, k = rope(q), rope(k)
    new_kc = k_cache.at[slots].set(k)
    new_vc = v_cache.at[slots].set(v)

    kh = jnp.repeat(k, GROUPS, axis=1)   # query head h -> kv head h // GROUPS
    vh = jnp.repeat(v, GROUPS, axis=1)
    s = jnp.einsum("qhd,khd->hqk", q, kh) * SCALE
    mask = jnp.tril(jnp.ones((T, T), dtype=bool))
    s = jnp.where(mask[None], s, -jnp.inf)
    p = jax.nn.softmax(s, axis=-1)
    o = jnp.einsum("hqk,khd->qhd", p, vh).reshape(T, H * HD)
    return o @ wo_t, new_kc, new_vc


if __name__ == "__main__":
    key = jax.random.PRNGKey(0)
    k1, k2, k3, k4, k5 = jax.random.split(key, 5)

    hidden = jax.random.normal(k1, (T, D), dtype=jnp.float32)
    # torch Linear weight is [out, in]; we store the transpose [in, out]
    wqkv_t = jax.random.normal(k2, (D, QKV_DIM), dtype=jnp.float32) * 0.1
    wo_t = jax.random.normal(k3, (D, D), dtype=jnp.float32) * 0.1

    # non-zero cache so the aliased "preserve untouched rows" path is actually tested
    k_cache = jax.random.normal(k4, (CACHE_SLOTS, KVH, HD), dtype=jnp.float32)
    v_cache = jax.random.normal(k5, (CACHE_SLOTS, KVH, HD), dtype=jnp.float32)
    slots = jnp.array([3, 7, 1, 12, 5, 9, 0, 14], dtype=jnp.int32)

    pos = jnp.arange(T, dtype=jnp.float32)
    inv_freq = 1.0 / (ROPE_THETA ** (jnp.arange(0, HD, 2, dtype=jnp.float32) / HD))
    freqs = pos[:, None] * inv_freq[None, :]
    cos, sin = jnp.cos(freqs), jnp.sin(freqs)       # [T, HD//2]

    out, new_kc, new_vc = dbrx_attention_forward(
        hidden, cos, sin, slots, k_cache, v_cache, wqkv_t, wo_t)
    jax.block_until_ready((out, new_kc, new_vc))

    ref_out, ref_kc, ref_vc = reference_forward(
        hidden, cos, sin, slots, k_cache, v_cache, wqkv_t, wo_t)

    np.testing.assert_allclose(np.asarray(out), np.asarray(ref_out), rtol=1e-4, atol=1e-4)
    np.testing.assert_allclose(np.asarray(new_kc), np.asarray(ref_kc), rtol=1e-4, atol=1e-4)
    np.testing.assert_allclose(np.asarray(new_vc), np.asarray(ref_vc), rtol=1e-4, atol=1e-4)

    print("KERNEL_OK")
</pallas_src>

<mosaic_0001>
module attributes {stable_mosaic.version = 11 : i64} {
  func.func @fused_attn_kernel(%arg0: i32, %arg1: memref<8x64xf32, #tpu.memory_space<vmem>>, %arg2: memref<64x128xf32, #tpu.memory_space<vmem>>, %arg3: memref<64x64xf32, #tpu.memory_space<vmem>>, %arg4: memref<8x8xf32, #tpu.memory_space<vmem>>, %arg5: memref<8x8xf32, #tpu.memory_space<vmem>>, %arg6: memref<8x64xf32, #tpu.memory_space<vmem>>, %arg7: memref<8x32xf32, #tpu.memory_space<vmem>>, %arg8: memref<8x32xf32, #tpu.memory_space<vmem>>, %arg9: memref<8x64xf32, #tpu.memory_space<vmem>>) attributes {dimension_semantics = [#tpu.dimension_semantics<parallel>], iteration_bounds = array<i64: 1>, scalar_prefetch = 0 : i64, scratch_operands = 1 : i64, tpu.core_type = #tpu.core_type<tc>, window_params = [{pipeline_mode = #tpu.pipeline_mode<synchronous>, transform_indices = @transform_0, window_bounds = array<i64: 8, 64>}, {pipeline_mode = #tpu.pipeline_mode<synchronous>, transform_indices = @transform_1, window_bounds = array<i64: 64, 128>}, {pipeline_mode = #tpu.pipeline_mode<synchronous>, transform_indices = @transform_2, window_bounds = array<i64: 64, 64>}, {pipeline_mode = #tpu.pipeline_mode<synchronous>, transform_indices = @transform_3, window_bounds = array<i64: 8, 8>}, {pipeline_mode = #tpu.pipeline_mode<synchronous>, transform_indices = @transform_4, window_bounds = array<i64: 8, 8>}, {pipeline_mode = #tpu.pipeline_mode<synchronous>, transform_indices = @transform_5, window_bounds = array<i64: 8, 64>}, {pipeline_mode = #tpu.pipeline_mode<synchronous>, transform_indices = @transform_6, window_bounds = array<i64: 8, 32>}, {pipeline_mode = #tpu.pipeline_mode<synchronous>, transform_indices = @transform_7, window_bounds = array<i64: 8, 32>}]} {
    %c0 = arith.constant 0 : index
    %c0_0 = arith.constant 0 : index
    %0 = vector.load %arg1[%c0, %c0_0] : memref<8x64xf32, #tpu.memory_space<vmem>>, vector<8x64xf32>
    %c0_1 = arith.constant 0 : index
    %c0_2 = arith.constant 0 : index
    %1 = vector.load %arg2[%c0_1, %c0_2] : memref<64x128xf32, #tpu.memory_space<vmem>>, vector<64x128xf32>
    %cst = arith.constant dense<0.000000e+00> : vector<8x128xf32>
    %2 = tpu.matmul %0, %1, %cst {dimension_numbers = #tpu.dot_dimension_numbers<[1], [0], [0], [1], [0, 0, 1, 1], [], []>} : vector<8x64xf32>, vector<64x128xf32>, vector<8x128xf32> -> vector<8x128xf32>
    %cst_3 = arith.constant -5.000000e-01 : f32
    %cst_4 = arith.constant 5.000000e-01 : f32
    %3 = vector.broadcast %cst_3 : f32 to vector<8x128xf32>
    %4 = arith.maximumf %3, %2 : vector<8x128xf32>
    %5 = vector.broadcast %cst_4 : f32 to vector<8x128xf32>
    %6 = arith.minimumf %5, %4 : vector<8x128xf32>
    %c0_5 = arith.constant 0 : index
    %c0_6 = arith.constant 0 : index
    %7 = vector.load %arg4[%c0_5, %c0_6] : memref<8x8xf32, #tpu.memory_space<vmem>>, vector<8x8xf32>
    %c0_7 = arith.constant 0 : index
    %c0_8 = arith.constant 0 : index
    %8 = vector.load %arg5[%c0_7, %c0_8] : memref<8x8xf32, #tpu.memory_space<vmem>>, vector<8x8xf32>
    %9 = tpu.iota {dimensions = array<i32: 0>} : vector<8x8xi32>
    %10 = tpu.iota {dimensions = array<i32: 1>} : vector<8x8xi32>
    %11 = arith.cmpi sle, %10, %9 : vector<8x8xi32>
    %12 = vector.extract_strided_slice %6 {offsets = [0, 64], sizes = [8, 8], strides = [1, 1]} : vector<8x128xf32> to vector<8x8xf32>
    %13 = vector.extract_strided_slice %6 {offsets = [0, 72], sizes = [8, 8], strides = [1, 1]} : vector<8x128xf32> to vector<8x8xf32>
    %14 = arith.mulf %12, %7 : vector<8x8xf32>
    %15 = arith.mulf %13, %8 : vector<8x8xf32>
    %16 = arith.subf %14, %15 : vector<8x8xf32>
    %17 = arith.mulf %13, %7 : vector<8x8xf32>
    %18 = arith.mulf %12, %8 : vector<8x8xf32>
    %19 = arith.addf %17, %18 : vector<8x8xf32>
    %c0_9 = arith.constant 0 : index
    %c0_10 = arith.constant 0 : index
    %20 = vector.load %arg7[%c0_9, %c0_10] : memref<8x32xf32, #tpu.memory_space<vmem>>, vector<8x8xf32>
    tpu.vector_store %arg7[%c0_9, %c0_10], %16 {strides = array<i32>} : memref<8x32xf32, #tpu.memory_space<vmem>>, vector<8x8xf32>,
    %c0_11 = arith.constant 0 : index
    %c8 = arith.constant 8 : index
    %21 = vector.load %arg7[%c0_11, %c8] : memref<8x32xf32, #tpu.memory_space<vmem>>, vector<8x8xf32>
    tpu.vector_store %arg7[%c0_11, %c8], %19 {strides = array<i32>} : memref<8x32xf32, #tpu.memory_space<vmem>>, vector<8x8xf32>,
    %22 = vector.extract_strided_slice %6 {offsets = [0, 96], sizes = [8, 16], strides = [1, 1]} : vector<8x128xf32> to vector<8x16xf32>
    %c0_12 = arith.constant 0 : index
    %c0_13 = arith.constant 0 : index
    %23 = vector.load %arg8[%c0_12, %c0_13] : memref<8x32xf32, #tpu.memory_space<vmem>>, vector<8x16xf32>
    tpu.vector_store %arg8[%c0_12, %c0_13], %22 {strides = array<i32>} : memref<8x32xf32, #tpu.memory_space<vmem>>, vector<8x16xf32>,
    %24 = vector.extract_strided_slice %6 {offsets = [0, 0], sizes = [8, 8], strides = [1, 1]} : vector<8x128xf32> to vector<8x8xf32>
    %25 = vector.extract_strided_slice %6 {offsets = [0, 8], sizes = [8, 8], strides = [1, 1]} : vector<8x128xf32> to vector<8x8xf32>
    %26 = arith.mulf %24, %7 : vector<8x8xf32>
    %27 = arith.mulf %25, %8 : vector<8x8xf32>
    %28 = arith.subf %26, %27 : vector<8x8xf32>
    %29 = arith.mulf %25, %7 : vector<8x8xf32>
    %30 = arith.mulf %24, %8 : vector<8x8xf32>
    %31 = arith.addf %29, %30 : vector<8x8xf32>
    %cst_14 = arith.constant dense<0.000000e+00> : vector<8x8xf32>
    %32 = tpu.matmul %28, %16, %cst_14 {dimension_numbers = #tpu.dot_dimension_numbers<[1], [1], [0], [0], [0, 0, 1, 0], [], []>} : vector<8x8xf32>, vector<8x8xf32>, vector<8x8xf32> -> vector<8x8xf32>
    %cst_15 = arith.constant dense<0.000000e+00> : vector<8x8xf32>
    %33 = tpu.matmul %31, %19, %cst_15 {dimension_numbers = #tpu.dot_dimension_numbers<[1], [1], [0], [0], [0, 0, 1, 0], [], []>} : vector<8x8xf32>, vector<8x8xf32>, vector<8x8xf32> -> vector<8x8xf32>
    %34 = arith.addf %32, %33 : vector<8x8xf32>
    %cst_16 = arith.constant 2.500000e-01 : f32
    %35 = vector.broadcast %cst_16 : f32 to vector<8x8xf32>
    %36 = arith.mulf %34, %35 : vector<8x8xf32>
    %cst_17 = arith.constant 0xFF800000 : f32
    %37 = vector.broadcast %cst_17 : f32 to vector<8x8xf32>
    %38 = arith.select %11, %36, %37 : vector<8x8xi1>, vector<8x8xf32>
    %cst_18 = arith.constant dense<0xFF800000> : vector<8xf32>
    %39 = vector.multi_reduction <maximumf>, %38, %cst_18 [1] : vector<8x8xf32> to vector<8xf32>
    %40 = vector.shape_cast %39 : vector<8xf32> to vector<8x1xf32>
    %41 = vector.broadcast %40 : vector<8x1xf32> to vector<8x8xf32>
    %42 = arith.subf %38, %41 : vector<8x8xf32>
    %43 = math.exp %42 : vector<8x8xf32>
    %cst_19 = arith.constant dense<0.000000e+00> : vector<8xf32>
    %44 = vector.multi_reduction <add>, %43, %cst_19 [1] : vector<8x8xf32> to vector<8xf32>
    %45 = vector.shape_cast %44 : vector<8xf32> to vector<8x1xf32>
    %cst_20 = arith.constant dense<0.000000e+00> : vector<8x16xf32>
    %46 = tpu.matmul %43, %22, %cst_20 {dimension_numbers = #tpu.dot_dimension_numbers<[1], [0], [0], [1], [0, 0, 1, 1], [], []>} : vector<8x8xf32>, vector<8x16xf32>, vector<8x16xf32> -> vector<8x16xf32>
    %47 = tpu.reciprocal %45 : vector<8x1xf32> -> vector<8x1xf32>
    %48 = vector.broadcast %47 : vector<8x1xf32> to vector<8x16xf32>
    %49 = arith.mulf %46, %48 : vector<8x16xf32>
    %c0_21 = arith.constant 0 : index
    %c0_22 = arith.constant 0 : index
    %50 = vector.load %arg9[%c0_21, %c0_22] : memref<8x64xf32, #tpu.memory_space<vmem>>, vector<8x16xf32>
    tpu.vector_store %arg9[%c0_21, %c0_22], %49 {strides = array<i32>} : memref<8x64xf32, #tpu.memory_space<vmem>>, vector<8x16xf32>,
    %51 = vector.extract_strided_slice %6 {offsets = [0, 16], sizes = [8, 8], strides = [1, 1]} : vector<8x128xf32> to vector<8x8xf32>
    %52 = vector.extract_strided_slice %6 {offsets = [0, 24], sizes = [8, 8], strides = [1, 1]} : vector<8x128xf32> to vector<8x8xf32>
    %53 = arith.mulf %51, %7 : vector<8x8xf32>
    %54 = arith.mulf %52, %8 : vector<8x8xf32>
    %55 = arith.subf %53, %54 : vector<8x8xf32>
    %56 = arith.mulf %52, %7 : vector<8x8xf32>
    %57 = arith.mulf %51, %8 : vector<8x8xf32>
    %58 = arith.addf %56, %57 : vector<8x8xf32>
    %cst_23 = arith.constant dense<0.000000e+00> : vector<8x8xf32>
    %59 = tpu.matmul %55, %16, %cst_23 {dimension_numbers = #tpu.dot_dimension_numbers<[1], [1], [0], [0], [0, 0, 1, 0], [], []>} : vector<8x8xf32>, vector<8x8xf32>, vector<8x8xf32> -> vector<8x8xf32>
    %cst_24 = arith.constant dense<0.000000e+00> : vector<8x8xf32>
    %60 = tpu.matmul %58, %19, %cst_24 {dimension_numbers = #tpu.dot_dimension_numbers<[1], [1], [0], [0], [0, 0, 1, 0], [], []>} : vector<8x8xf32>, vector<8x8xf32>, vector<8x8xf32> -> vector<8x8xf32>
    %61 = arith.addf %59, %60 : vector<8x8xf32>
    %cst_25 = arith.constant 2.500000e-01 : f32
    %62 = vector.broadcast %cst_25 : f32 to vector<8x8xf32>
    %63 = arith.mulf %61, %62 : vector<8x8xf32>
    %cst_26 = arith.constant 0xFF800000 : f32
    %64 = vector.broadcast %cst_26 : f32 to vector<8x8xf32>
    %65 = arith.select %11, %63, %64 : vector<8x8xi1>, vector<8x8xf32>
    %cst_27 = arith.constant dense<0xFF800000> : vector<8xf32>
    %66 = vector.multi_reduction <maximumf>, %65, %cst_27 [1] : vector<8x8xf32> to vector<8xf32>
    %67 = vector.shape_cast %66 : vector<8xf32> to vector<8x1xf32>
    %68 = vector.broadcast %67 : vector<8x1xf32> to vector<8x8xf32>
    %69 = arith.subf %65, %68 : vector<8x8xf32>
    %70 = math.exp %69 : vector<8x8xf32>
    %cst_28 = arith.constant dense<0.000000e+00> : vector<8xf32>
    %71 = vector.multi_reduction <add>, %70, %cst_28 [1] : vector<8x8xf32> to vector<8xf32>
    %72 = vector.shape_cast %71 : vector<8xf32> to vector<8x1xf32>
    %cst_29 = arith.constant dense<0.000000e+00> : vector<8x16xf32>
    %73 = tpu.matmul %70, %22, %cst_29 {dimension_numbers = #tpu.dot_dimension_numbers<[1], [0], [0], [1], [0, 0, 1, 1], [], []>} : vector<8x8xf32>, vector<8x16xf32>, vector<8x16xf32> -> vector<8x16xf32>
    %74 = tpu.reciprocal %72 : vector<8x1xf32> -> vector<8x1xf32>
    %75 = vector.broadcast %74 : vector<8x1xf32> to vector<8x16xf32>
    %76 = arith.mulf %73, %75 : vector<8x16xf32>
    %c0_30 = arith.constant 0 : index
    %c16 = arith.constant 16 : index
    %77 = vector.load %arg9[%c0_30, %c16] : memref<8x64xf32, #tpu.memory_space<vmem>>, vector<8x16xf32>
    tpu.vector_store %arg9[%c0_30, %c16], %76 {strides = array<i32>} : memref<8x64xf32, #tpu.memory_space<vmem>>, vector<8x16xf32>,
    %78 = vector.extract_strided_slice %6 {offsets = [0, 80], sizes = [8, 8], strides = [1, 1]} : vector<8x128xf32> to vector<8x8xf32>
    %79 = vector.extract_strided_slice %6 {offsets = [0, 88], sizes = [8, 8], strides = [1, 1]} : vector<8x128xf32> to vector<8x8xf32>
    %80 = arith.mulf %78, %7 : vector<8x8xf32>
    %81 = arith.mulf %79, %8 : vector<8x8xf32>
    %82 = arith.subf %80, %81 : vector<8x8xf32>
    %83 = arith.mulf %79, %7 : vector<8x8xf32>
    %84 = arith.mulf %78, %8 : vector<8x8xf32>
    %85 = arith.addf %83, %84 : vector<8x8xf32>
    %c0_31 = arith.constant 0 : index
    %c16_32 = arith.constant 16 : index
    %86 = vector.load %arg7[%c0_31, %c16_32] : memref<8x32xf32, #tpu.memory_space<vmem>>, vector<8x8xf32>
    tpu.vector_store %arg7[%c0_31, %c16_32], %82 {strides = array<i32>} : memref<8x32xf32, #tpu.memory_space<vmem>>, vector<8x8xf32>,
    %c0_33 = arith.constant 0 : index
    %c24 = arith.constant 24 : index
    %87 = vector.load %arg7[%c0_33, %c24] : memref<8x32xf32, #tpu.memory_space<vmem>>, vector<8x8xf32>
    tpu.vector_store %arg7[%c0_33, %c24], %85 {strides = array<i32>} : memref<8x32xf32, #tpu.memory_space<vmem>>, vector<8x8xf32>,
    %88 = vector.extract_strided_slice %6 {offsets = [0, 112], sizes = [8, 16], strides = [1, 1]} : vector<8x128xf32> to vector<8x16xf32>
    %c0_34 = arith.constant 0 : index
    %c16_35 = arith.constant 16 : index
    %89 = vector.load %arg8[%c0_34, %c16_35] : memref<8x32xf32, #tpu.memory_space<vmem>>, vector<8x16xf32>
    tpu.vector_store %arg8[%c0_34, %c16_35], %88 {strides = array<i32>} : memref<8x32xf32, #tpu.memory_space<vmem>>, vector<8x16xf32>,
    %90 = vector.extract_strided_slice %6 {offsets = [0, 32], sizes = [8, 8], strides = [1, 1]} : vector<8x128xf32> to vector<8x8xf32>
    %91 = vector.extract_strided_slice %6 {offsets = [0, 40], sizes = [8, 8], strides = [1, 1]} : vector<8x128xf32> to vector<8x8xf32>
    %92 = arith.mulf %90, %7 : vector<8x8xf32>
    %93 = arith.mulf %91, %8 : vector<8x8xf32>
    %94 = arith.subf %92, %93 : vector<8x8xf32>
    %95 = arith.mulf %91, %7 : vector<8x8xf32>
    %96 = arith.mulf %90, %8 : vector<8x8xf32>
    %97 = arith.addf %95, %96 : vector<8x8xf32>
    %cst_36 = arith.constant dense<0.000000e+00> : vector<8x8xf32>
    %98 = tpu.matmul %94, %82, %cst_36 {dimension_numbers = #tpu.dot_dimension_numbers<[1], [1], [0], [0], [0, 0, 1, 0], [], []>} : vector<8x8xf32>, vector<8x8xf32>, vector<8x8xf32> -> vector<8x8xf32>
    %cst_37 = arith.constant dense<0.000000e+00> : vector<8x8xf32>
    %99 = tpu.matmul %97, %85, %cst_37 {dimension_numbers = #tpu.dot_dimension_numbers<[1], [1], [0], [0], [0, 0, 1, 0], [], []>} : vector<8x8xf32>, vector<8x8xf32>, vector<8x8xf32> -> vector<8x8xf32>
    %100 = arith.addf %98, %99 : vector<8x8xf32>
    %cst_38 = arith.constant 2.500000e-01 : f32
    %101 = vector.broadcast %cst_38 : f32 to vector<8x8xf32>
    %102 = arith.mulf %100, %101 : vector<8x8xf32>
    %cst_39 = arith.constant 0xFF800000 : f32
    %103 = vector.broadcast %cst_39 : f32 to vector<8x8xf32>
    %104 = arith.select %11, %102, %103 : vector<8x8xi1>, vector<8x8xf32>
    %cst_40 = arith.constant dense<0xFF800000> : vector<8xf32>
    %105 = vector.multi_reduction <maximumf>, %104, %cst_40 [1] : vector<8x8xf32> to vector<8xf32>
    %106 = vector.shape_cast %105 : vector<8xf32> to vector<8x1xf32>
    %107 = vector.broadcast %106 : vector<8x1xf32> to vector<8x8xf32>
    %108 = arith.subf %104, %107 : vector<8x8xf32>
    %109 = math.exp %108 : vector<8x8xf32>
    %cst_41 = arith.constant dense<0.000000e+00> : vector<8xf32>
    %110 = vector.multi_reduction <add>, %109, %cst_41 [1] : vector<8x8xf32> to vector<8xf32>
    %111 = vector.shape_cast %110 : vector<8xf32> to vector<8x1xf32>
    %cst_42 = arith.constant dense<0.000000e+00> : vector<8x16xf32>
    %112 = tpu.matmul %109, %88, %cst_42 {dimension_numbers = #tpu.dot_dimension_numbers<[1], [0], [0], [1], [0, 0, 1, 1], [], []>} : vector<8x8xf32>, vector<8x16xf32>, vector<8x16xf32> -> vector<8x16xf32>
    %113 = tpu.reciprocal %111 : vector<8x1xf32> -> vector<8x1xf32>
    %114 = vector.broadcast %113 : vector<8x1xf32> to vector<8x16xf32>
    %115 = arith.mulf %112, %114 : vector<8x16xf32>
    %c0_43 = arith.constant 0 : index
    %c32 = arith.constant 32 : index
    %116 = vector.load %arg9[%c0_43, %c32] : memref<8x64xf32, #tpu.memory_space<vmem>>, vector<8x16xf32>
    tpu.vector_store %arg9[%c0_43, %c32], %115 {strides = array<i32>} : memref<8x64xf32, #tpu.memory_space<vmem>>, vector<8x16xf32>,
    %117 = vector.extract_strided_slice %6 {offsets = [0, 48], sizes = [8, 8], strides = [1, 1]} : vector<8x128xf32> to vector<8x8xf32>
    %118 = vector.extract_strided_slice %6 {offsets = [0, 56], sizes = [8, 8], strides = [1, 1]} : vector<8x128xf32> to vector<8x8xf32>
    %119 = arith.mulf %117, %7 : vector<8x8xf32>
    %120 = arith.mulf %118, %8 : vector<8x8xf32>
    %121 = arith.subf %119, %120 : vector<8x8xf32>
    %122 = arith.mulf %118, %7 : vector<8x8xf32>
    %123 = arith.mulf %117, %8 : vector<8x8xf32>
    %124 = arith.addf %122, %123 : vector<8x8xf32>
    %cst_44 = arith.constant dense<0.000000e+00> : vector<8x8xf32>
    %125 = tpu.matmul %121, %82, %cst_44 {dimension_numbers = #tpu.dot_dimension_numbers<[1], [1], [0], [0], [0, 0, 1, 0], [], []>} : vector<8x8xf32>, vector<8x8xf32>, vector<8x8xf32> -> vector<8x8xf32>
    %cst_45 = arith.constant dense<0.000000e+00> : vector<8x8xf32>
    %126 = tpu.matmul %124, %85, %cst_45 {dimension_numbers = #tpu.dot_dimension_numbers<[1], [1], [0], [0], [0, 0, 1, 0], [], []>} : vector<8x8xf32>, vector<8x8xf32>, vector<8x8xf32> -> vector<8x8xf32>
    %127 = arith.addf %125, %126 : vector<8x8xf32>
    %cst_46 = arith.constant 2.500000e-01 : f32
    %128 = vector.broadcast %cst_46 : f32 to vector<8x8xf32>
    %129 = arith.mulf %127, %128 : vector<8x8xf32>
    %cst_47 = arith.constant 0xFF800000 : f32
    %130 = vector.broadcast %cst_47 : f32 to vector<8x8xf32>
    %131 = arith.select %11, %129, %130 : vector<8x8xi1>, vector<8x8xf32>
    %cst_48 = arith.constant dense<0xFF800000> : vector<8xf32>
    %132 = vector.multi_reduction <maximumf>, %131, %cst_48 [1] : vector<8x8xf32> to vector<8xf32>
    %133 = vector.shape_cast %132 : vector<8xf32> to vector<8x1xf32>
    %134 = vector.broadcast %133 : vector<8x1xf32> to vector<8x8xf32>
    %135 = arith.subf %131, %134 : vector<8x8xf32>
    %136 = math.exp %135 : vector<8x8xf32>
    %cst_49 = arith.constant dense<0.000000e+00> : vector<8xf32>
    %137 = vector.multi_reduction <add>, %136, %cst_49 [1] : vector<8x8xf32> to vector<8xf32>
    %138 = vector.shape_cast %137 : vector<8xf32> to vector<8x1xf32>
    %cst_50 = arith.constant dense<0.000000e+00> : vector<8x16xf32>
    %139 = tpu.matmul %136, %88, %cst_50 {dimension_numbers = #tpu.dot_dimension_numbers<[1], [0], [0], [1], [0, 0, 1, 1], [], []>} : vector<8x8xf32>, vector<8x16xf32>, vector<8x16xf32> -> vector<8x16xf32>
    %140 = tpu.reciprocal %138 : vector<8x1xf32> -> vector<8x1xf32>
    %141 = vector.broadcast %140 : vector<8x1xf32> to vector<8x16xf32>
    %142 = arith.mulf %139, %141 : vector<8x16xf32>
    %c0_51 = arith.constant 0 : index
    %c48 = arith.constant 48 : index
    %143 = vector.load %arg9[%c0_51, %c48] : memref<8x64xf32, #tpu.memory_space<vmem>>, vector<8x16xf32>
    tpu.vector_store %arg9[%c0_51, %c48], %142 {strides = array<i32>} : memref<8x64xf32, #tpu.memory_space<vmem>>, vector<8x16xf32>,
    %c0_52 = arith.constant 0 : index
    %c0_53 = arith.constant 0 : index
    %144 = vector.load %arg9[%c0_52, %c0_53] : memref<8x64xf32, #tpu.memory_space<vmem>>, vector<8x64xf32>
    %c0_54 = arith.constant 0 : index
    %c0_55 = arith.constant 0 : index
    %145 = vector.load %arg3[%c0_54, %c0_55] : memref<64x64xf32, #tpu.memory_space<vmem>>, vector<64x64xf32>
    %cst_56 = arith.constant dense<0.000000e+00> : vector<8x64xf32>
    %146 = tpu.matmul %144, %145, %cst_56 {dimension_numbers = #tpu.dot_dimension_numbers<[1], [0], [0], [1], [0, 0, 1, 1], [], []>} : vector<8x64xf32>, vector<64x64xf32>, vector<8x64xf32> -> vector<8x64xf32>
    %c0_57 = arith.constant 0 : index
    %c0_58 = arith.constant 0 : index
    %147 = vector.load %arg6[%c0_57, %c0_58] : memref<8x64xf32, #tpu.memory_space<vmem>>, vector<8x64xf32>
    tpu.vector_store %arg6[%c0_57, %c0_58], %146 {strides = array<i32>} : memref<8x64xf32, #tpu.memory_space<vmem>>, vector<8x64xf32>,
    return
  }
  func.func @transform_0(%arg0: i32) -> (i32, i32) {
    %c0_i32 = arith.constant 0 : i32
    %c0_i32_0 = arith.constant 0 : i32
    %c0_i32_1 = arith.constant 0 : i32
    return %c0_i32, %c0_i32_0 : i32, i32
  }
  func.func @transform_1(%arg0: i32) -> (i32, i32) {
    %c0_i32 = arith.constant 0 : i32
    %c0_i32_0 = arith.constant 0 : i32
    %c0_i32_1 = arith.constant 0 : i32
    return %c0_i32, %c0_i32_0 : i32, i32
  }
  func.func @transform_2(%arg0: i32) -> (i32, i32) {
    %c0_i32 = arith.constant 0 : i32
    %c0_i32_0 = arith.constant 0 : i32
    %c0_i32_1 = arith.constant 0 : i32
    return %c0_i32, %c0_i32_0 : i32, i32
  }
  func.func @transform_3(%arg0: i32) -> (i32, i32) {
    %c0_i32 = arith.constant 0 : i32
    %c0_i32_0 = arith.constant 0 : i32
    %c0_i32_1 = arith.constant 0 : i32
    return %c0_i32, %c0_i32_0 : i32, i32
  }
  func.func @transform_4(%arg0: i32) -> (i32, i32) {
    %c0_i32 = arith.constant 0 : i32
    %c0_i32_0 = arith.constant 0 : i32
    %c0_i32_1 = arith.constant 0 : i32
    return %c0_i32, %c0_i32_0 : i32, i32
  }
  func.func @transform_5(%arg0: i32) -> (i32, i32) {
    %c0_i32 = arith.constant 0 : i32
    %c0_i32_0 = arith.constant 0 : i32
    %c0_i32_1 = arith.constant 0 : i32
    return %c0_i32, %c0_i32_0 : i32, i32
  }
  func.func @transform_6(%arg0: i32) -> (i32, i32) {
    %c0_i32 = arith.constant 0 : i32
    %c0_i32_0 = arith.constant 0 : i32
    %c0_i32_1 = arith.constant 0 : i32
    return %c0_i32, %c0_i32_0 : i32, i32
  }
  func.func @transform_7(%arg0: i32) -> (i32, i32) {
    %c0_i32 = arith.constant 0 : i32
    %c0_i32_0 = arith.constant 0 : i32
    %c0_i32_1 = arith.constant 0 : i32
    return %c0_i32, %c0_i32_0 : i32, i32
  }
}

</mosaic_0001>

<bundles_post_ra>
// kernel: tpu_custom_call.1
= control target key start
LH: loop header
LB: loop body
LE: loop exit
PB: predicated region body
PF: predicated region fallthrough
CT: control target
= control target key end

     0   :  { %13 = vsyncpa [#allocation4], 0  ;;  %s1379_s0 = inlined_call_operand.hbm [shape: f32[8,64], index: 0, kind: input, shape index: {}]   ;;  %s1380_s1 = inlined_call_operand.hbm [shape: f32[64,128], index: 1, kind: input, shape index: {}]   ;;  %s1381_s2 = inlined_call_operand.hbm [shape: f32[64,64], index: 2, kind: input, shape index: {}]   ;;  %s1382_s3 = inlined_call_operand.hbm [shape: f32[8,8], index: 3, kind: input, shape index: {}]   ;;  %s1383_s4 = inlined_call_operand.hbm [shape: f32[8,8], index: 4, kind: input, shape index: {}]   ;;  %s1384_s5 = inlined_call_operand.hbm [shape: f32[8,64], index: 5, kind: output, shape index: {0}]   ;;  %s1385_s6 = inlined_call_operand.hbm [shape: f32[8,32], index: 6, kind: output, shape index: {1}]   ;;  %s1386_s7 = inlined_call_operand.hbm [shape: f32[8,32], index: 7, kind: output, shape index: {2}]  }
   0x1   :  { %14 = vsyncpa [#allocation7], 0 }
   0x2   :  { %15 = vsyncpa [#allocation10], 0 }
   0x3   :  { %16 = vsyncpa [#allocation5], 0  ;;  %s33_s26 = sshll.u32 %s1380_s1, 4  ;;  %s34_s26 = int_to_ptr.hbm [resolvable:$true] %s33_s26 }
   0x4   :  { %17 = vsyncpa [#allocation14], 0  ;;  %s1100_s27 = smov [#allocation6]   ;;  %s60_s8 = sshll.u32 %s1382_s3, 4  ;;  %s61_s8 = int_to_ptr.hbm [resolvable:$true] %s60_s8 }
   0x5   :  { %s35_s28 = sshll.u32 %s1100_s27, 4  ;;  %s1101_s9 = smov 128   ;;  %s36_s28 = int_to_ptr.vmem [resolvable:$true] %s35_s28 }
   0x6   :  { %s1102_s10 = smov 8   ;;  %s1103_s11 = smov [#allocation9]  }
   0x7   :  { %41 = dma.hbm_to_vmem [thread:$0]  %s34_s26, 1024, %s36_s28, [#allocation7], %s1101_s9, %s1101_s9, %s1102_s10  }
   0x8   :  { %s62_s12 = sshll.u32 %s1103_s11, 4  ;;  %s23_s1 = sshll.u32 %s1379_s0, 4  ;;  %s63_s12 = int_to_ptr.vmem [resolvable:$true] %s62_s12  ;;  %s24_s1 = int_to_ptr.hbm [resolvable:$true] %s23_s1 }
   0x9   :  { %65 = dma.hbm_to_vmem [thread:$0]  %s61_s8, 128, %s63_s12, [#allocation10]  }
   0xa   :  { %s46_s17 = sshll.u32 %s1381_s2, 4  ;;  %s1104_s18 = smov [#allocation3]   ;;  %s47_s17 = int_to_ptr.hbm [resolvable:$true] %s46_s17 }
   0xb   :  { %s25_s3 = sshll.u32 %s1104_s18, 4  ;;  %s1105_s19 = smov [#allocation8]   ;;  %s26_s3 = int_to_ptr.vmem [resolvable:$true] %s25_s3 }
   0xc   :  { %28 = dma.hbm_to_vmem [thread:$0]  %s24_s1, 128, %s26_s3, [#allocation4]  }
   0xd   :  { %s48_s20 = sshll.u32 %s1105_s19, 4  ;;  %s71_s23 = sshll.u32 %s1383_s4, 4  ;;  %s49_s20 = int_to_ptr.vmem [resolvable:$true] %s48_s20  ;;  %s72_s23 = int_to_ptr.hbm [resolvable:$true] %s71_s23 }
   0xe   :  { %54 = dma.hbm_to_vmem [thread:$0]  %s47_s17, 1024, %s49_s20, [#allocation7], %s1101_s9, %s1101_s9, %s1102_s10  }
   0xf   :  { %s1106_s0 = smov [#allocation11]  }
  0x10   :  { %s73_s24 = sshll.u32 %s1106_s0, 4  ;;  %s74_s24 = int_to_ptr.vmem [resolvable:$true] %s73_s24 }
  0x11   :  { %76 = dma.hbm_to_vmem [thread:$0]  %s72_s23, 128, %s74_s24, [#allocation10]  }
  0x12   :  { %1090 = dma.done.wait [#allocation4], 128  }
  0x13   :  { %1091 = vsyncadd [#allocation4], 4294967168 }
  0x14   :  { %1092 = dma.done.wait [#allocation7], 2048  }
  0x15   :  { %1093 = vsyncadd [#allocation7], 4294965248 }
  0x16   :  { %1094 = dma.done.wait [#allocation10], 256  }
  0x17   :  { %1095 = vsyncadd [#allocation10], 4294967040  ;;  %v105_v0 = vld [vmem:[#allocation6 + $0x38] sm:$0xff]  ;;  %v104_v1 = vld [vmem:[#allocation6 + $0x30] sm:$0xff]  ;;  %s1107_s2 = smov 72   ;;  %s1108_s4 = smov 64  }
  0x18   :  { %118 = vmatpush.msra.mxu0 %v105_v0  ;;  %v103_v2 = vld [vmem:[#allocation6 + $0x28] sm:$0xff]  ;;  %v1183_v4 = vld [vmem:[#allocation9] sm:$0xff]  ;;  %v101_v6 = vld [vmem:[#allocation6 + $0x18] sm:$0xff]  ;;  %vm106_vm0 = vcmask 523264   ;;  %s1109_s25 = smov 120   ;;  %s1110_s26 = smov 80  }
  0x19   :  { %v1181_v3 = vld [vmem:[#allocation11] sm:$0xff]  ;;  %v102_v5 = vld [vmem:[#allocation6 + $0x20] sm:$0xff]  ;;  %140 = vrot.lane.b32.xlu1 %v1183_v4, %s1108_s4  ;;  %v100_v7 = vld [vmem:[#allocation6 + $0x10] sm:$0xff]  ;;  %s1111_s27 = smov 88   ;;  %s1112_s28 = smov 48   ;;  %vm183_vm1 = vcmask 130048  }
  0x1a   :  { %119 = vmatpush.msra.mxu0 %v104_v1  ;;  %145 = vrot.lane.b32.xlu0 %v1181_v3, %s1107_s2  ;;  %v99_v8 = vld [vmem:[#allocation6 + $0x8] sm:$0xff]  ;;  %v98_v9 = vld [vmem:[#allocation6] sm:$0xff]  ;;  %v97_v10 = vld [vmem:[#allocation3] sm:$0xff]  ;;  %s1113_s29 = smov 40   ;;  %s1114_s30 = smov 56   ;;  %vm438_vm2 = vcmask 261248   ;;  %v134_v1 = vlaneseq }
  0x1b   :  { %s1115_s8 = smov 32   ;;  %s1116_s9 = smov 16   ;;  %vm171_vm3 = vcmask 64512  }
  0x1c   :  { %120 = vmatpush.msra.mxu0 %v103_v2  ;;  %s1117_s11 = smov 24   ;;  %s1118_s12 = smov 104  }
  0x1d   :  { %s1120_s13 = smov 96   ;;  %s1121_s14 = smov [#allocation13]  }
  0x1e   :  { %121 = vmatpush.msra.mxu0 %v102_v5  ;;  %v1287_v5 = vand.u32 127, %v134_v1  ;;  %s801_s1 = sshll.u32 %s1121_s14, 4  ;;  %s803_s17 = sshll.u32 %s1385_s6, 4  ;;  %s802_s1 = int_to_ptr.vmem [resolvable:$true] %s801_s1  ;;  %s804_s17 = int_to_ptr.hbm [resolvable:$true] %s803_s17 }
  0x1f   :  { %s1122_s18 = smov [#allocation15]   ;;  %s814_s21 = sshll.u32 %s1386_s7, 4  ;;  %s815_s21 = int_to_ptr.hbm [resolvable:$true] %s814_s21 }
  0x20   :  { %122 = vmatpush.msra.mxu0 %v101_v6  ;;  %s812_s3 = sshll.u32 %s1122_s18, 4  ;;  %s1123_s22 = smov [#allocation12]   ;;  %s813_s3 = int_to_ptr.vmem [resolvable:$true] %s812_s3 }
  0x21   :  { %154 = vrot.lane.b32.xlu1 %v1183_v4, %s1107_s2  ;;  %s790_s23 = sshll.u32 %s1123_s22, 4  ;;  %s791_s23 = int_to_ptr.vmem [resolvable:$true] %s790_s23 }
  0x22   :  { %123 = vmatpush.msra.mxu0 %v100_v7  ;;  %158 = vrot.lane.b32.xlu0 %v1181_v3, %s1108_s4 }
  0x24   :  { %124 = vmatpush.msra.mxu0 %v99_v8 }
  0x26   :  { %125 = vmatpush.msra.mxu0 %v98_v9 }
  0x27   :  { %835 = vmatmul.msk.f32.vlgmr.msra.gmra.mxu0 %vm106_vm0, %v97_v10 }
  0x29   :  { %195 = vrot.lane.b32.xlu1 %v1183_v4, %s1102_s10 }
  0x2a   :  { %186 = vrot.lane.b32.xlu0 %v1181_v3, %s1102_s10 }
  0x8b   :  { %v141_v20 = vpop.permute.xlu1 %140 }
  0x8c   :  { %v146_v11 = vpop.permute.xlu0 %145 }
  0x93   :  { %v155_v24 = vpop.permute.xlu1 %154 }
  0x94   :  { %v159_v15 = vpop.permute.xlu0 %158 }
  0x9b   :  { %v196_v28 = vpop.permute.xlu1 %195 }
  0x9c   :  { %v187_v18 = vpop.permute.xlu0 %186 }
  0xa4   :  { %v127_v12 = vpop.f32.mrf.mxu0 }
  0xa5   :  { %v1198_v13 = vclamps-f32 %v127_v12, 0.5 }
  0xa7   :  { %v148_v14 = vmul.f32 %v1198_v13, %v146_v11  ;;  %v161_v16 = vmul.f32 %v1198_v13, %v159_v15  ;;  %v199_v17 = vmul.f32 %v1198_v13, %v1181_v3  ;;  %v189_v19 = vmul.f32 %v1198_v13, %v187_v18 }
  0xa8   :  { %v143_v21 = vmul.f32 %v1198_v13, %v141_v20  ;;  %v157_v25 = vmul.f32 %v1198_v13, %v155_v24  ;;  %v198_v29 = vmul.f32 %v1198_v13, %v196_v28  ;;  %v185_v42 = vmul.f32 %v1198_v13, %v1183_v4 }
  0xa9   :  { %150 = vrot.lane.b32.xlu2 %v148_v14, %s1109_s25 }
  0xb1   :  { %163 = vrot.lane.b32.xlu2 %v161_v16, %s1102_s10 }
  0xb9   :  { %201 = vrot.lane.b32.xlu2 %v199_v17, %s1102_s10 }
  0xc1   :  { %191 = vrot.lane.b32.xlu2 %v189_v19, %s1109_s25 }
  0xc9   :  { %457 = vrot.lane.b32.xlu2 %v1181_v3, %s1110_s26 }
  0xd1   :  { %444 = vrot.lane.b32.xlu2 %v1181_v3, %s1111_s27 }
  0xd9   :  { %638 = vrot.lane.b32.xlu2 %v1181_v3, %s1112_s28 }
  0xe1   :  { %453 = vrot.lane.b32.xlu2 %v1183_v4, %s1111_s27 }
  0xe9   :  { %492 = vrot.lane.b32.xlu2 %v1183_v4, %s1113_s29 }
  0xf1   :  { %440 = vrot.lane.b32.xlu2 %v1183_v4, %s1110_s26 }
  0xf9   :  { %621 = vrot.lane.b32.xlu2 %v1183_v4, %s1112_s28 }
 0x101   :  { %634 = vrot.lane.b32.xlu2 %v1183_v4, %s1114_s30 }
 0x103   :  { %v151_v22 = vpop.permute.xlu2 %150 }
 0x104   :  { %v153_v23 = vsub.f32 %v143_v21, %v151_v22 }
 0x106   :  { %168 = vrot.lane.b32.xlu0 %v153_v23, %s1108_s4 }
 0x109   :  { %180 = vrot.lane.b32.xlu2 %v1198_v13, %s1115_s8 }
 0x10b   :  { %v164_v26 = vpop.permute.xlu2 %163 }
 0x10c   :  { %v1229_v27 = vadd.f32 %v164_v26, %v157_v25 }
 0x10e   :  { %208 = vrot.lane.b32.xlu1 %v1229_v27, %s1114_s30 }
 0x113   :  { %v202_v30 = vpop.permute.xlu2 %201 }
 0x114   :  { %v204_v31 = vadd.f32 %v202_v30, %v198_v29 }
 0x116   :  { %326 = vrot.lane.b32.xlu1 %v1181_v3, %s1116_s9  ;;  %206 = vrot.lane.b32.xlu0 %v204_v31, %s1109_s25 }
 0x11b   :  { %v192_v32 = vpop.permute.xlu2 %191 }
 0x11c   :  { %v194_v44 = vsub.f32 %v185_v42, %v192_v32 }
 0x11e   :  { %496 = vrot.lane.b32.xlu1 %v1181_v3, %s1115_s8  ;;  %313 = vrot.lane.b32.xlu0 %v1181_v3, %s1117_s11 }
 0x123   :  { %v458_v33 = vpop.permute.xlu2 %457 }
 0x124   :  { %v460_v50 = vmul.f32 %v1198_v13, %v458_v33 }
 0x126   :  { %625 = vrot.lane.b32.xlu1 %v1181_v3, %s1114_s30  ;;  %483 = vrot.lane.b32.xlu0 %v1181_v3, %s1113_s29 }
 0x12b   :  { %v445_v34 = vpop.permute.xlu2 %444 }
 0x12c   :  { %v447_v53 = vmul.f32 %v1198_v13, %v445_v34 }
 0x12e   :  { %322 = vrot.lane.b32.xlu0 %v1183_v4, %s1117_s11 }
 0x133   :  { %v639_v35 = vpop.permute.xlu2 %638 }
 0x134   :  { %v641_v59 = vmul.f32 %v1198_v13, %v639_v35 }
 0x136   :  { %309 = vrot.lane.b32.xlu0 %v1183_v4, %s1116_s9 }
 0x13b   :  { %v454_v36 = vpop.permute.xlu2 %453 }
 0x13c   :  { %v456_v2 = vmul.f32 %v1198_v13, %v454_v36 }
 0x143   :  { %v1245_v37 = vpop.permute.xlu2 %492 }
 0x144   :  { %v495_v16 = vmul.f32 %v1198_v13, %v1245_v37 }
 0x14b   :  { %v1247_v38 = vpop.permute.xlu2 %440 }
 0x14c   :  { %v443_v17 = vmul.f32 %v1198_v13, %v1247_v38 }
 0x153   :  { %v1249_v39 = vpop.permute.xlu2 %621 }
 0x154   :  { %v624_v28 = vmul.f32 %v1198_v13, %v1249_v39 }
 0x15b   :  { %v1251_v40 = vpop.permute.xlu2 %634 }
 0x15c   :  { %v637_v31 = vmul.f32 %v1198_v13, %v1251_v40 }
 0x163   :  { %v181_v41 = vpop.permute.xlu2 %180 }
 0x164   :  { %184 = vst.msk [vmem:[#allocation15] sm:$0xff] %vm183_vm1, %v181_v41  ;;  %288 = vmatpush.msra.mxu3 %v181_v41  ;;  %414 = vmatpush.msra.mxu2 %v181_v41 }
 0x165   :  { %478 = vst.msk [vmem:[#allocation15] sm:$0xff] %vm438_vm2, %v181_v41 }
 0x178   :  { %v169_v43 = vpop.permute.xlu0 %168 }
 0x179   :  { %172 = vst.msk [vmem:[#allocation13] sm:$0xff] %vm171_vm3, %v169_v43  ;;  %839 = vmatpush.xpose.msk.msrb.mxu0 %vm171_vm3, %v169_v43 }
 0x17c   :  { %840 = vmatmul.msk.f32.vlgmr.msrb.gmra.mxu0 %vm171_vm3, %v194_v44 }
 0x180   :  { %v209_v45 = vpop.permute.xlu1 %208 }
 0x181   :  { %837 = vmatpush.xpose.msk.msra.mxu1 %vm171_vm3, %v209_v45  ;;  %842 = vmatpush.xpose.msk.msrb.mxu3 %vm171_vm3, %v209_v45 }
 0x185   :  { %844 = vmatpush.xpose.msk.msrb.mxu1 %vm171_vm3, %v169_v43 }
 0x188   :  { %v327_v46 = vpop.permute.xlu1 %326  ;;  %v207_v47 = vpop.permute.xlu0 %206 }
 0x189   :  { %v329_v48 = vmul.f32 %v1198_v13, %v327_v46  ;;  %838 = vmatmul.msk.f32.vlgmr.msra.gmra.mxu1 %vm171_vm3, %v207_v47 }
 0x18b   :  { %331 = vrot.lane.b32.xlu1 %v329_v48, %s1102_s10 }
 0x190   :  { %v314_v49 = vpop.permute.xlu0 %313  ;;  %v497_v52 = vpop.permute.xlu1 %496 }
 0x191   :  { %v316_v51 = vmul.f32 %v1198_v13, %v314_v49  ;;  %v499_v54 = vmul.f32 %v1198_v13, %v497_v52 }
 0x193   :  { %462 = vrot.lane.b32.xlu1 %v460_v50, %s1102_s10  ;;  %318 = vrot.lane.b32.xlu0 %v316_v51, %s1109_s25 }
 0x198   :  { %v484_v55 = vpop.permute.xlu0 %483  ;;  %v626_v57 = vpop.permute.xlu1 %625 }
 0x199   :  { %v486_v56 = vmul.f32 %v1198_v13, %v484_v55  ;;  %v628_v58 = vmul.f32 %v1198_v13, %v626_v57 }
 0x19b   :  { %501 = vrot.lane.b32.xlu1 %v499_v54, %s1102_s10  ;;  %449 = vrot.lane.b32.xlu0 %v447_v53, %s1109_s25 }
 0x1a0   :  { %v323_v60 = vpop.permute.xlu0 %322 }
 0x1a1   :  { %v325_v61 = vmul.f32 %v1198_v13, %v323_v60 }
 0x1a3   :  { %479 = vrot.lane.b32.xlu1 %v1183_v4, %s1115_s8  ;;  %488 = vrot.lane.b32.xlu0 %v486_v56, %s1109_s25  ;;  %v1285_v4 = vshrl.u32 %v134_v1, 7 }
 0x1a5   :  { %vm138_vm4 = vcmp.le.s32.totalorder %v1287_v5, %v1285_v4 }
 0x1a8   :  { %v310_v62 = vpop.permute.xlu0 %309 }
 0x1a9   :  { %v312_v3 = vmul.f32 %v1198_v13, %v310_v62 }
 0x1ab   :  { %630 = vrot.lane.b32.xlu1 %v628_v58, %s1109_s25 }
 0x1b3   :  { %643 = vrot.lane.b32.xlu1 %v641_v59, %s1102_s10  ;;  %s1119_s10 = smov 112  }
 0x1f9   :  { %v256_v8 = vpop.f32.mrf.mxu0 }
 0x1fd   :  { %v332_v63 = vpop.permute.xlu1 %331 }
 0x1fe   :  { %v334_v0 = vadd.f32 %v332_v63, %v325_v61 }
 0x200   :  { %336 = vrot.lane.b32.xlu1 %v334_v0, %s1118_s12 }
 0x205   :  { %v463_v6 = vpop.permute.xlu1 %462  ;;  %v319_v7 = vpop.permute.xlu0 %318 }
 0x206   :  { %v1289_v9 = vadd.f32 %v463_v6, %v456_v2  ;;  %v321_v10 = vsub.f32 %v312_v3, %v319_v7  ;;  %v231_v11 = vpop.f32.mrf.mxu1 }
 0x207   :  { %v257_v12 = vadd.f32 %v256_v8, %v231_v11 }
 0x208   :  { %508 = vrot.lane.b32.xlu2 %v1289_v9, %s1113_s29  ;;  %361 = vrot.lane.b32.xlu1 %v321_v10, %s1119_s10 }
 0x209   :  { %v259_v14 = vmul.f32 0.25, %v257_v12 }
 0x20b   :  { %v260_v15 = vsel %vm138_vm4, %v259_v14, -inf }
 0x20c   :  { %v261_v18 = vsel %vm171_vm3, %v260_v15, -inf }
 0x20d   :  { %v502_v19 = vpop.permute.xlu1 %501  ;;  %262 = vmax.xlane.f32.xlu0 %v261_v18  ;;  %v450_v20 = vpop.permute.xlu0 %449 }
 0x20e   :  { %v504_v21 = vadd.f32 %v502_v19, %v495_v16  ;;  %v1303_v22 = vsub.f32 %v443_v17, %v450_v20 }
 0x210   :  { %506 = vrot.lane.b32.xlu2 %v504_v21, %s1111_s27  ;;  %537 = vrot.lane.b32.xlu1 %v1303_v22, %s1112_s28 }
 0x215   :  { %v480_v23 = vpop.permute.xlu1 %479  ;;  %v489_v25 = vpop.permute.xlu0 %488 }
 0x216   :  { %v482_v24 = vmul.f32 %v1198_v13, %v480_v23 }
 0x218   :  { %v491_v26 = vsub.f32 %v482_v24, %v489_v25 }
 0x21a   :  { %535 = vrot.lane.b32.xlu2 %v491_v26, %s1120_s13 }
 0x21d   :  { %v631_v29 = vpop.permute.xlu1 %630 }
 0x21e   :  { %v633_v30 = vsub.f32 %v624_v28, %v631_v29 }
 0x220   :  { %673 = vrot.lane.b32.xlu1 %v633_v30, %s1110_s26 }
 0x225   :  { %v644_v32 = vpop.permute.xlu1 %643 }
 0x226   :  { %v646_v33 = vadd.f32 %v644_v32, %v637_v31 }
 0x228   :  { %648 = vrot.lane.b32.xlu2 %v646_v33, %s1107_s2  ;;  %s792_s2 = sshll.u32 %s1384_s5, 4  ;;  %s793_s2 = int_to_ptr.hbm [resolvable:$true] %s792_s2 }
 0x262   :  { %v509_v34 = vpop.permute.xlu2 %508 }
 0x263   :  { %852 = vmatpush.xpose.msk.msra.mxu0 %vm171_vm3, %v509_v34 }
 0x26a   :  { %v507_v35 = vpop.permute.xlu2 %506 }
 0x272   :  { %v337_v36 = vpop.permute.xlu1 %336 }
 0x274   :  { %v536_v37 = vpop.permute.xlu2 %535 }
 0x27a   :  { %v362_v38 = vpop.permute.xlu1 %361 }
 0x27b   :  { %845 = vmatmul.msk.f32.vlgmr.msrb.gmra.mxu1 %vm171_vm3, %v362_v38 }
 0x280   :  { %v263_v39 = vpop.xlane.xlu0 %262 }
 0x281   :  { %v264_v41 = vsub.f32 %v260_v15, %v263_v39 }
 0x282   :  { %v538_v42 = vpop.permute.xlu1 %537  ;;  %v649_v43 = vpop.permute.xlu2 %648 }
 0x283   :  { %v265_v44 = vmul.f32 1.442695, %v264_v41  ;;  %849 = vmatpush.xpose.msk.msra.mxu1 %vm171_vm3, %v538_v42  ;;  %853 = vmatmul.msk.f32.vlgmr.msra.gmra.mxu0 %vm171_vm3, %v649_v43 }
 0x285   :  { %882 = vpow2.f32 %v265_v44 }
 0x286   :  { %850 = vmatmul.msk.f32.vlgmr.msra.gmra.mxu1 %vm171_vm3, %v536_v37 }
 0x28b   :  { %v883_v40 = vpop.eup %882 }
 0x28c   :  { %841 = vmatmul.msk.f32.vlgmr.msra.gmra.mxu3 %vm171_vm3, %v883_v40  ;;  %v267_v17 = vsel %vm171_vm3, %v883_v40, 0.0 }
 0x28d   :  { %847 = vmatpush.xpose.msk.msra.mxu3 %vm171_vm3, %v509_v34 }
 0x292   :  { %v674_v45 = vpop.permute.xlu1 %673 }
 0x294   :  { %843 = vmatmul.msk.f32.vlgmr.msrb.gmra.mxu3 %vm171_vm3, %v337_v36 }
 0x295   :  { %854 = vmatpush.xpose.msk.msrb.mxu3 %vm171_vm3, %v538_v42 }
 0x29c   :  { %848 = vmatmul.msk.f32.vlgmr.msra.gmra.mxu3 %vm171_vm3, %v507_v35 }
 0x2a4   :  { %855 = vmatmul.msk.f32.vlgmr.msrb.gmra.mxu3 %vm171_vm3, %v674_v45 }
 0x2f8   :  { %v382_v47 = vpop.f32.mrf.mxu1 }
 0x300   :  { %v669_v59 = vpop.f32.mrf.mxu0 }
 0x303   :  { %v560_v53 = vpop.f32.mrf.mxu1 }
 0x30f   :  { %v1326_v46 = vpop.f32.mrf.mxu3 }
 0x317   :  { %v357_v48 = vpop.f32.mrf.mxu3 }
 0x318   :  { %v383_v49 = vadd.f32 %v382_v47, %v357_v48 }
 0x31a   :  { %v385_v50 = vmul.f32 0.25, %v383_v49 }
 0x31c   :  { %v386_v51 = vsel %vm138_vm4, %v385_v50, -inf }
 0x31d   :  { %v387_v52 = vsel %vm171_vm3, %v386_v51, -inf }
 0x31e   :  { %388 = vmax.xlane.f32.xlu1 %v387_v52 }
 0x31f   :  { %v531_v54 = vpop.f32.mrf.mxu3 }
 0x320   :  { %v561_v55 = vadd.f32 %v560_v53, %v531_v54 }
 0x322   :  { %v563_v56 = vmul.f32 0.25, %v561_v55 }
 0x324   :  { %v564_v57 = vsel %vm138_vm4, %v563_v56, -inf }
 0x325   :  { %v565_v58 = vsel %vm171_vm3, %v564_v57, -inf }
 0x326   :  { %566 = vmax.xlane.f32.xlu2 %v565_v58 }
 0x327   :  { %v694_v60 = vpop.f32.mrf.mxu3 }
 0x328   :  { %v695_v61 = vadd.f32 %v694_v60, %v669_v59 }
 0x32a   :  { %v697_v62 = vmul.f32 0.25, %v695_v61 }
 0x32c   :  { %v698_v63 = vsel %vm138_vm4, %v697_v62, -inf }
 0x32d   :  { %v699_v0 = vsel %vm171_vm3, %v698_v63, -inf }
 0x32e   :  { %700 = vmax.xlane.f32.xlu0 %v699_v0 }
 0x342   :  { %574 = vrot.lane.b32.xlu0 %v1198_v13, %s1116_s9 }
 0x391   :  { %v389_v1 = vpop.xlane.xlu1 %388 }
 0x392   :  { %v390_v2 = vsub.f32 %v386_v51, %v389_v1 }
 0x394   :  { %v391_v3 = vmul.f32 1.442695, %v390_v2 }
 0x396   :  { %884 = vpow2.f32 %v391_v3 }
 0x399   :  { %v567_v6 = vpop.xlane.xlu2 %566 }
 0x39a   :  { %v568_v7 = vsub.f32 %v564_v57, %v567_v6 }
 0x39c   :  { %v885_v8 = vpop.eup %884  ;;  %v569_v10 = vmul.f32 1.442695, %v568_v7 }
 0x39d   :  { %846 = vmatmul.msk.f32.vlgmr.msra.gmra.mxu2 %vm171_vm3, %v885_v8  ;;  %v393_v11 = vsel %vm171_vm3, %v885_v8, 0.0 }
 0x39e   :  { %886 = vpow2.f32 %v569_v10  ;;  %394 = vadd.xlane.f32.xlu0 %v393_v11  ;;  %v759_v11 = vld [vmem:[#allocation8 + $0x30] sm:$0xff] }
 0x3a1   :  { %v701_v4 = vpop.xlane.xlu0 %700 }
 0x3a2   :  { %v702_v5 = vsub.f32 %v698_v63, %v701_v4  ;;  %v757_v4 = vld [vmem:[#allocation8 + $0x20] sm:$0xff] }
 0x3a4   :  { %v887_v12 = vpop.eup %886  ;;  %v703_v14 = vmul.f32 1.442695, %v702_v5  ;;  %v756_v5 = vld [vmem:[#allocation8 + $0x18] sm:$0xff] }
 0x3a5   :  { %v571_v13 = vsel %vm171_vm3, %v887_v12, 0.0 }
 0x3a6   :  { %888 = vpow2.f32 %v703_v14  ;;  %572 = vadd.xlane.f32.xlu2 %v571_v13  ;;  %v754_v14 = vld [vmem:[#allocation8 + $0x8] sm:$0xff]  ;;  %v753_v13 = vld [vmem:[#allocation8] sm:$0xff] }
 0x3ac   :  { %v889_v15 = vpop.eup %888 }
 0x3ad   :  { %v705_v16 = vsel %vm171_vm3, %v889_v15, 0.0 }
 0x3ae   :  { %706 = vadd.xlane.f32.xlu1 %v705_v16  ;;  %268 = vadd.xlane.f32.xlu2 %v267_v17 }
 0x3b4   :  { %v575_v18 = vpop.permute.xlu0 %574 }
 0x3b5   :  { %595 = vmatpush.msrb.mxu2 %v575_v18  ;;  %726 = vmatpush.msrb.mxu1 %v575_v18 }
 0x3b6   :  { %851 = vmatmul.msk.f32.vlgmr.msrb.gmra.mxu2 %vm171_vm3, %v887_v12  ;;  %856 = vmatmul.msk.f32.vlgmr.msrb.gmra.mxu1 %vm171_vm3, %v889_v15  ;;  %v755_v12 = vld [vmem:[#allocation8 + $0x10] sm:$0xff] }
 0x411   :  { %v395_v19 = vpop.xlane.xlu0 %394 }
 0x412   :  { %890 = vrcp.f32 %v395_v19  ;;  %v430_v25 = vand.u32 2147483648, %v395_v19  ;;  %v428_v28 = vand.u32 2147483647, %v395_v19  ;;  %vm424_vm6 = vweird.f32 %v395_v19 }
 0x414   :  { %v431_v30 = vor.u32 1.1754944e-38, %v430_v25  ;;  %vm429_vm8 = vcmp.eq.f32.partialorder %v428_v28, 8.507059e+37 }
 0x418   :  { %v891_v20 = vpop.eup %890 }
 0x419   :  { %v420_v21 = vmul.f32 %v891_v20, %v395_v19  ;;  %v1349_v23 = vpop.xlane.xlu2 %572  ;;  %vm425_vm5 = vweird.f32 %v891_v20 }
 0x41a   :  { %892 = vrcp.f32 %v1349_v23  ;;  %vm426_vm7 = vmor %vm424_vm6, %vm425_vm5  ;;  %v611_v63 = vand.u32 2147483648, %v1349_v23  ;;  %vm605_vm5 = vweird.f32 %v1349_v23  ;;  %v609_v1 = vand.u32 2147483647, %v1349_v23 }
 0x41b   :  { %v421_v24 = vsub.f32 1.0, %v420_v21 }
 0x41c   :  { %v612_v6 = vor.u32 1.1754944e-38, %v611_v63 }
 0x41d   :  { %v422_v26 = vmul.f32 %v891_v20, %v421_v24 }
 0x41f   :  { %v423_v29 = vadd.f32 %v891_v20, %v422_v26 }
 0x420   :  { %v416_v34 = vpop.f32.mrf.mxu2  ;;  %v893_v36 = vpop.eup %892 }
 0x421   :  { %v427_v31 = vsel %vm426_vm7, %v891_v20, %v423_v29  ;;  %v707_v32 = vpop.xlane.xlu1 %706  ;;  %v269_v33 = vpop.xlane.xlu2 %268  ;;  %v601_v38 = vmul.f32 %v893_v36, %v1349_v23  ;;  %vm606_vm3 = vweird.f32 %v893_v36  ;;  %vm610_vm7 = vcmp.eq.f32.partialorder %v609_v1, 8.507059e+37 }
 0x422   :  { %v432_v35 = vsel %vm429_vm8, %v431_v30, %v427_v31  ;;  %894 = vrcp.f32 %v707_v32  ;;  %v742_v47 = vand.u32 2147483648, %v707_v32  ;;  %v304_v48 = vand.u32 2147483648, %v269_v33  ;;  %vm607_vm6 = vmor %vm605_vm5, %vm606_vm3 }
 0x423   :  { %v433_v37 = vmul.f32 %v432_v35, %v416_v34  ;;  %896 = vrcp.f32 %v269_v33  ;;  %v602_v43 = vsub.f32 1.0, %v601_v38  ;;  %v740_v50 = vand.u32 2147483647, %v707_v32 }
 0x424   :  { %v302_v52 = vand.u32 2147483647, %v269_v33  ;;  %vm736_vm11 = vweird.f32 %v707_v32  ;;  %vm298_vm12 = vweird.f32 %v269_v33  ;;  %v743_v56 = vor.u32 1.1754944e-38, %v742_v47 }
 0x425   :  { %435 = vrot.lane.b32.xlu1 %v433_v37, %s1116_s9  ;;  %v603_v53 = vmul.f32 %v893_v36, %v602_v43  ;;  %v305_v57 = vor.u32 1.1754944e-38, %v304_v48  ;;  %vm741_vm15 = vcmp.eq.f32.partialorder %v740_v50, 8.507059e+37  ;;  %vm177_vm8 = vcmask 130112  }
 0x426   :  { %vm303_vm4 = vcmp.eq.f32.partialorder %v302_v52, 8.507059e+37 }
 0x427   :  { %v604_v60 = vadd.f32 %v893_v36, %v603_v53 }
 0x428   :  { %v895_v39 = vpop.eup %894 }
 0x429   :  { %v897_v41 = vpop.eup %896  ;;  %v732_v42 = vmul.f32 %v895_v39, %v707_v32  ;;  %vm737_vm9 = vweird.f32 %v895_v39  ;;  %v608_v3 = vsel %vm607_vm6, %v893_v36, %v604_v60 }
 0x42a   :  { %v294_v44 = vmul.f32 %v897_v41, %v269_v33  ;;  %vm299_vm10 = vweird.f32 %v897_v41  ;;  %vm738_vm13 = vmor %vm736_vm11, %vm737_vm9  ;;  %v613_v8 = vsel %vm610_vm7, %v612_v6, %v608_v3  ;;  %vm470_vm9 = vcmask 195712  }
 0x42b   :  { %v733_v40 = vsub.f32 1.0, %v732_v42  ;;  %vm300_vm14 = vmor %vm298_vm12, %vm299_vm10  ;;  %vm476_vm10 = vcmask 261312   ;;  %vm750_vm11 = vcmask 523648  }
 0x42c   :  { %v295_v45 = vsub.f32 1.0, %v294_v44 }
 0x42d   :  { %174 = vrot.lane.b32.xlu1 %v1229_v27, %s1108_s4  ;;  %v734_v49 = vmul.f32 %v895_v39, %v733_v40 }
 0x42e   :  { %v296_v51 = vmul.f32 %v897_v41, %v295_v45 }
 0x42f   :  { %v735_v54 = vadd.f32 %v895_v39, %v734_v49 }
 0x430   :  { %v297_v55 = vadd.f32 %v897_v41, %v296_v51 }
 0x431   :  { %v739_v58 = vsel %vm738_vm13, %v895_v39, %v735_v54 }
 0x432   :  { %v301_v59 = vsel %vm300_vm14, %v897_v41, %v297_v55  ;;  %v744_v27 = vsel %vm741_vm15, %v743_v56, %v739_v58 }
 0x433   :  { %v306_v61 = vsel %vm303_vm4, %v305_v57, %v301_v59  ;;  %v728_v62 = vpop.f32.mrf.mxu1 }
 0x434   :  { %v745_v0 = vmul.f32 %v744_v27, %v728_v62  ;;  %v307_v2 = vmul.f32 %v306_v61, %v1326_v46  ;;  %v760_v46 = vld [vmem:[#allocation8 + $0x38] sm:$0xff] }
 0x435   :  { %473 = vrot.lane.b32.xlu1 %v1289_v9, %s1108_s4  ;;  %772 = vmatpush.msra.mxu2 %v760_v46  ;;  %v758_v9 = vld [vmem:[#allocation8 + $0x28] sm:$0xff] }
 0x436   :  { %747 = vrot.lane.b32.xlu0 %v745_v0, %s1112_s28  ;;  %308 = vst.msk [vmem:[#allocation2] sm:$0xff] %vm183_vm1, %v307_v2  ;;  %vm619_vm1 = vcmask 392448  }
 0x437   :  { %773 = vmatpush.msra.mxu2 %v759_v11 }
 0x439   :  { %v597_v7 = vpop.f32.mrf.mxu2  ;;  %774 = vmatpush.msra.mxu2 %v758_v9 }
 0x43a   :  { %v614_v10 = vmul.f32 %v613_v8, %v597_v7 }
 0x43b   :  { %775 = vmatpush.msra.mxu2 %v757_v4 }
 0x43c   :  { %616 = vrot.lane.b32.xlu2 %v614_v10, %s1115_s8 }
 0x43d   :  { %776 = vmatpush.msra.mxu2 %v756_v5 }
 0x43f   :  { %777 = vmatpush.msra.mxu2 %v755_v12 }
 0x441   :  { %778 = vmatpush.msra.mxu2 %v754_v14 }
 0x443   :  { %779 = vmatpush.msra.mxu2 %v753_v13 }
 0x444   :  { %467 = vrot.lane.b32.xlu2 %v1303_v22, %s1108_s4 }
 0x496   :  { %v617_v15 = vpop.permute.xlu2 %616 }
 0x497   :  { %v436_v16 = vpop.permute.xlu1 %435 }
 0x498   :  { %439 = vst.msk [vmem:[#allocation2] sm:$0xff] %vm438_vm2, %v436_v16 }
 0x499   :  { %620 = vst.msk [vmem:[#allocation2] sm:$0xff] %vm619_vm1, %v617_v15 }
 0x49e   :  { %v468_v17 = vpop.permute.xlu2 %467 }
 0x49f   :  { %v175_v22 = vpop.permute.xlu1 %174 }
 0x4a0   :  { %178 = vst.msk [vmem:[#allocation13] sm:$0xff] %vm177_vm8, %v175_v22 }
 0x4a1   :  { %471 = vst.msk [vmem:[#allocation13] sm:$0xff] %vm470_vm9, %v468_v17 }
 0x4a7   :  { %v474_v18 = vpop.permute.xlu1 %473 }
 0x4a8   :  { %v748_v19 = vpop.permute.xlu0 %747  ;;  %477 = vst.msk [vmem:[#allocation13] sm:$0xff] %vm476_vm10, %v474_v18 }
 0x4a9   :  { %751 = vst.msk [vmem:[#allocation2] sm:$0xff] %vm750_vm11, %v748_v19  ;;  %806 = dma.vmem_to_hbm [thread:$0]  %s802_s1, 128, %s804_s17, [#allocation14]  }
 0x4aa   :  { %817 = dma.vmem_to_hbm [thread:$0]  %s813_s3, 128, %s815_s21, [#allocation14]  }
 0x4b0   :  { %v752_v20 = vld [vmem:[#allocation2] sm:$0xff] }
 0x4b1   :  { %857 = vmatmul.msk.f32.vlgmr.msra.gmra.mxu2 %vm106_vm0, %v752_v20 }
 0x534   :  { %v781_v21 = vpop.f32.mrf.mxu2 }
 0x535   :  { %784 = vst.msk [vmem:[#allocation12] sm:$0xff] %vm106_vm0, %v781_v21 }
 0x536   :  { %795 = dma.vmem_to_hbm [thread:$0]  %s791_s23, 128, %s793_s2, [#allocation5]  }
 0x537   :  { %1096 = dma.done.wait [#allocation5], 128  }
 0x538   :  { %1097 = vsyncadd [#allocation5], 4294967168 }
 0x539   :  { %1098 = dma.done.wait [#allocation14], 256  }
 0x53a   :  { %1099 = vsyncadd [#allocation14], 4294967040 }
 0x53b   :  { %830 = vsyncpa [#allocation4], 1 }
 0x53c   :  { %831 = vsyncpa [#allocation7], 1 }
 0x53d   :  { %832 = vsyncpa [#allocation10], 1 }
 0x53e   :  { %833 = vsyncpa [#allocation5], 1 }
 0x53f   :  { %834 = vsyncpa [#allocation14], 1 }

</bundles_post_ra>
